<compile_context>
chip_gen: v7x
topology: tpu7x:2x2x1
jax: 0.10.0
libtpu: 0.0.40
codegen_flags: <defaults>
</compile_context>

<pallas_src>
import functools

import jax
import jax.numpy as jnp
from jax.experimental import pallas as pl
from jax.experimental.pallas import tpu as pltpu

_LANE = 128
_SUBLANE = 8


def _round_up(x, m):
    return (x + m - 1) // m * m


def _mlp_kernel(x_ref, w1_ref, b1_ref, w2_ref, b2_ref, out_ref):
    # Two MXU matmuls (bf16 in, f32 acc) + VPU relu + EUP sigmoid, one batch tile.
    x = x_ref[...]                                                    # (TB, In_p) bf16
    h = jnp.dot(x, w1_ref[...], preferred_element_type=jnp.float32)   # (TB, H_p) f32
    h = jnp.maximum(h + b1_ref[...], 0.0)                             # bias + ReLU in f32
    h = h.astype(jnp.bfloat16)                                        # bf16 for 2nd MXU pass
    z = jnp.dot(h, w2_ref[...], preferred_element_type=jnp.float32)   # (TB, Out_p) f32
    z = z + b2_ref[...]
    out_ref[...] = jax.nn.sigmoid(z).astype(out_ref.dtype)            # lane-dense f32 store


@functools.partial(jax.jit, static_argnames=("block_rows",))
def customer_purchase_net(x, w1, b1, w2, b2, *, block_rows=512):
    """Forward pass of CustomerPurchaseNet.

    x  : (B, input_size) float32
    w1 : (input_size, hidden_size)   b1 : (hidden_size,) or (1, hidden_size)
    w2 : (hidden_size, output_size)  b2 : (output_size,) or (1, output_size)
    returns (B, output_size) float32 purchase probabilities.
    """
    B, in_size = x.shape
    hidden_size = w1.shape[1]
    out_size = w2.shape[1]
    b1 = b1.reshape(1, hidden_size)
    b2 = b2.reshape(1, out_size)

    # Lane-align every feature dim; pad batch to a multiple of the row tile.
    in_p = _round_up(in_size, _LANE)
    hid_p = _round_up(hidden_size, _LANE)
    out_p = _round_up(out_size, _LANE)

    tb = min(block_rows, _round_up(B, _SUBLANE))
    tb = _round_up(tb, _SUBLANE)
    b_p = _round_up(B, tb)

    # Zero-padded, bf16 matmul operands (biases stay f32 for the elementwise path).
    xp = jnp.zeros((b_p, in_p), jnp.bfloat16).at[:B, :in_size].set(x.astype(jnp.bfloat16))
    w1p = jnp.zeros((in_p, hid_p), jnp.bfloat16).at[:in_size, :hidden_size].set(
        w1.astype(jnp.bfloat16))
    b1p = jnp.zeros((1, hid_p), jnp.float32).at[:, :hidden_size].set(b1.astype(jnp.float32))
    w2p = jnp.zeros((hid_p, out_p), jnp.bfloat16).at[:hidden_size, :out_size].set(
        w2.astype(jnp.bfloat16))
    b2p = jnp.zeros((1, out_p), jnp.float32).at[:, :out_size].set(b2.astype(jnp.float32))

    grid = (b_p // tb,)

    out_padded = pl.pallas_call(
        _mlp_kernel,
        out_shape=jax.ShapeDtypeStruct((b_p, out_p), jnp.float32),
        grid_spec=pl.GridSpec(
            grid=grid,
            in_specs=[
                pl.BlockSpec((tb, in_p), lambda i: (i, 0)),     # x: streamed per batch tile
                pl.BlockSpec((in_p, hid_p), lambda i: (0, 0)),  # W1: VMEM-resident
                pl.BlockSpec((1, hid_p), lambda i: (0, 0)),     # b1: VMEM-resident
                pl.BlockSpec((hid_p, out_p), lambda i: (0, 0)),  # W2: VMEM-resident
                pl.BlockSpec((1, out_p), lambda i: (0, 0)),     # b2: VMEM-resident
            ],
            out_specs=pl.BlockSpec((tb, out_p), lambda i: (i, 0)),  # streamed, lane-dense
        ),
        compiler_params=pltpu.CompilerParams(
            # Batch tiles are independent -> shard across v7x's two TensorCores.
            dimension_semantics=("parallel",),
        ),
    )(xp, w1p, b1p, w2p, b2p)

    # Strip padded batch rows and padded output columns (they hold sigmoid(0)=0.5).
    return out_padded[:B, :out_size]


def _reference(x, w1, b1, w2, b2):
    h = jnp.maximum(x @ w1 + b1.reshape(1, -1), 0.0)
    return jax.nn.sigmoid(h @ w2 + b2.reshape(1, -1))


if __name__ == "__main__":
    # Small shapes implied by the module: input_size=16, hidden_size=32, output_size=4.
    input_size, hidden_size, output_size = 16, 32, 4

    key = jax.random.PRNGKey(0)
    k1, kb1, k2, kb2, kx1, kx2 = jax.random.split(key, 6)

    # Deterministic init mirroring PyTorch nn.Linear default: U(-1/sqrt(fan_in), ...).
    lim1 = 1.0 / jnp.sqrt(input_size)
    lim2 = 1.0 / jnp.sqrt(hidden_size)
    w1 = jax.random.uniform(k1, (input_size, hidden_size), jnp.float32, -lim1, lim1)
    b1 = jax.random.uniform(kb1, (1, hidden_size), jnp.float32, -lim1, lim1)
    w2 = jax.random.uniform(k2, (hidden_size, output_size), jnp.float32, -lim2, lim2)
    b2 = jax.random.uniform(kb2, (1, output_size), jnp.float32, -lim2, lim2)

    # Test 1: tiny batch (single tile, single grid step).
    x_small = jax.random.normal(kx1, (8, input_size), dtype=jnp.float32)
    out_small = jax.block_until_ready(customer_purchase_net(x_small, w1, b1, w2, b2))
    ref_small = _reference(x_small, w1, b1, w2, b2)
    assert out_small.shape == (8, output_size)
    assert jnp.allclose(out_small, ref_small, atol=2e-2, rtol=2e-2), "small-batch mismatch"

    # Test 2: multi-tile grid with a ragged tail (200 rows, 64-row tiles -> 4 tiles).
    x_big = jax.random.normal(kx2, (200, input_size), dtype=jnp.float32)
    out_big = jax.block_until_ready(
        customer_purchase_net(x_big, w1, b1, w2, b2, block_rows=64))
    ref_big = _reference(x_big, w1, b1, w2, b2)
    assert out_big.shape == (200, output_size)
    assert jnp.allclose(out_big, ref_big, atol=2e-2, rtol=2e-2), "multi-tile mismatch"

    print("KERNEL_OK")
</pallas_src>

<mosaic_0001>
module attributes {stable_mosaic.version = 11 : i64} {
  func.func @_mlp_kernel(%arg0: i32, %arg1: memref<8x128xbf16, #tpu.memory_space<vmem>>, %arg2: memref<128x128xbf16, #tpu.memory_space<vmem>>, %arg3: memref<1x128xf32, #tpu.memory_space<vmem>>, %arg4: memref<128x128xbf16, #tpu.memory_space<vmem>>, %arg5: memref<1x128xf32, #tpu.memory_space<vmem>>, %arg6: memref<8x128xf32, #tpu.memory_space<vmem>>) attributes {dimension_semantics = [#tpu.dimension_semantics<parallel>], iteration_bounds = array<i64: 1>, scalar_prefetch = 0 : i64, scratch_operands = 0 : i64, tpu.core_type = #tpu.core_type<tc>, window_params = [{transform_indices = @transform_0, window_bounds = array<i64: 8, 128>}, {pipeline_mode = #tpu.pipeline_mode<synchronous>, transform_indices = @transform_1, window_bounds = array<i64: 128, 128>}, {pipeline_mode = #tpu.pipeline_mode<synchronous>, transform_indices = @transform_2, window_bounds = array<i64: 1, 128>}, {pipeline_mode = #tpu.pipeline_mode<synchronous>, transform_indices = @transform_3, window_bounds = array<i64: 128, 128>}, {pipeline_mode = #tpu.pipeline_mode<synchronous>, transform_indices = @transform_4, window_bounds = array<i64: 1, 128>}, {transform_indices = @transform_5, window_bounds = array<i64: 8, 128>}]} {
    %c0 = arith.constant 0 : index
    %c0_0 = arith.constant 0 : index
    %0 = vector.load %arg1[%c0, %c0_0] : memref<8x128xbf16, #tpu.memory_space<vmem>>, vector<8x128xbf16>
    %c0_1 = arith.constant 0 : index
    %c0_2 = arith.constant 0 : index
    %1 = vector.load %arg2[%c0_1, %c0_2] : memref<128x128xbf16, #tpu.memory_space<vmem>>, vector<128x128xbf16>
    %cst = arith.constant dense<0.000000e+00> : vector<8x128xf32>
    %2 = tpu.matmul %0, %1, %cst {dimension_numbers = #tpu.dot_dimension_numbers<[1], [0], [0], [1], [0, 0, 1, 1], [], []>} : vector<8x128xbf16>, vector<128x128xbf16>, vector<8x128xf32> -> vector<8x128xf32>
    %c0_3 = arith.constant 0 : index
    %c0_4 = arith.constant 0 : index
    %3 = vector.load %arg3[%c0_3, %c0_4] : memref<1x128xf32, #tpu.memory_space<vmem>>, vector<1x128xf32>
    %4 = vector.broadcast %3 : vector<1x128xf32> to vector<8x128xf32>
    %5 = arith.addf %2, %4 : vector<8x128xf32>
    %cst_5 = arith.constant 0.000000e+00 : f32
    %6 = vector.broadcast %cst_5 : f32 to vector<8x128xf32>
    %7 = arith.maximumf %5, %6 : vector<8x128xf32>
    %8 = arith.truncf %7 : vector<8x128xf32> to vector<8x128xbf16>
    %c0_6 = arith.constant 0 : index
    %c0_7 = arith.constant 0 : index
    %9 = vector.load %arg4[%c0_6, %c0_7] : memref<128x128xbf16, #tpu.memory_space<vmem>>, vector<128x128xbf16>
    %cst_8 = arith.constant dense<0.000000e+00> : vector<8x128xf32>
    %10 = tpu.matmul %8, %9, %cst_8 {dimension_numbers = #tpu.dot_dimension_numbers<[1], [0], [0], [1], [0, 0, 1, 1], [], []>} : vector<8x128xbf16>, vector<128x128xbf16>, vector<8x128xf32> -> vector<8x128xf32>
    %c0_9 = arith.constant 0 : index
    %c0_10 = arith.constant 0 : index
    %11 = vector.load %arg5[%c0_9, %c0_10] : memref<1x128xf32, #tpu.memory_space<vmem>>, vector<1x128xf32>
    %12 = vector.broadcast %11 : vector<1x128xf32> to vector<8x128xf32>
    %13 = arith.addf %10, %12 : vector<8x128xf32>
    %14 = arith.negf %13 : vector<8x128xf32>
    %15 = math.exp %14 : vector<8x128xf32>
    %cst_11 = arith.constant 1.000000e+00 : f32
    %16 = vector.broadcast %cst_11 : f32 to vector<8x128xf32>
    %17 = arith.addf %16, %15 : vector<8x128xf32>
    %18 = arith.divf %16, %17 : vector<8x128xf32>
    %c0_12 = arith.constant 0 : index
    %c0_13 = arith.constant 0 : index
    %19 = vector.load %arg6[%c0_12, %c0_13] : memref<8x128xf32, #tpu.memory_space<vmem>>, vector<8x128xf32>
    tpu.vector_store %arg6[%c0_12, %c0_13], %18 {strides = array<i32>} : memref<8x128xf32, #tpu.memory_space<vmem>>, vector<8x128xf32>,
    return
  }
  func.func @transform_0(%arg0: i32) -> (i32, i32) {
    %c0_i32 = arith.constant 0 : i32
    %c0_i32_0 = arith.constant 0 : i32
    return %arg0, %c0_i32 : i32, i32
  }
  func.func @transform_1(%arg0: i32) -> (i32, i32) {
    %c0_i32 = arith.constant 0 : i32
    %c0_i32_0 = arith.constant 0 : i32
    %c0_i32_1 = arith.constant 0 : i32
    return %c0_i32, %c0_i32_0 : i32, i32
  }
  func.func @transform_2(%arg0: i32) -> (i32, i32) {
    %c0_i32 = arith.constant 0 : i32
    %c0_i32_0 = arith.constant 0 : i32
    %c0_i32_1 = arith.constant 0 : i32
    return %c0_i32, %c0_i32_0 : i32, i32
  }
  func.func @transform_3(%arg0: i32) -> (i32, i32) {
    %c0_i32 = arith.constant 0 : i32
    %c0_i32_0 = arith.constant 0 : i32
    %c0_i32_1 = arith.constant 0 : i32
    return %c0_i32, %c0_i32_0 : i32, i32
  }
  func.func @transform_4(%arg0: i32) -> (i32, i32) {
    %c0_i32 = arith.constant 0 : i32
    %c0_i32_0 = arith.constant 0 : i32
    %c0_i32_1 = arith.constant 0 : i32
    return %c0_i32, %c0_i32_0 : i32, i32
  }
  func.func @transform_5(%arg0: i32) -> (i32, i32) {
    %c0_i32 = arith.constant 0 : i32
    %c0_i32_0 = arith.constant 0 : i32
    return %arg0, %c0_i32 : i32, i32
  }
}

</mosaic_0001>

<bundles_post_ra>
// kernel: customer_purchase_net.1
= control target key start
LH: loop header
LB: loop body
LE: loop exit
PB: predicated region body
PF: predicated region fallthrough
CT: control target
= control target key end

     0   :  { %v356_v0 = vmov 0.0   ;;  %vm357_vm0 = vmmov 0   ;;  %s448_s1 = inlined_call_operand.vmem [shape: bf16[128,128], index: 1, kind: input, shape index: {}]   ;;  %s449_s3 = inlined_call_operand.vmem [shape: bf16[128,128], index: 3, kind: input, shape index: {}]   ;;  %s450_s0 = inlined_call_operand.vmem [shape: bf16[8,128], index: 0, kind: input, shape index: {}]   ;;  %s451_s2 = inlined_call_operand.vmem [shape: f32[1,128], index: 2, kind: input, shape index: {}]   ;;  %s452_s4 = inlined_call_operand.vmem [shape: f32[1,128], index: 4, kind: input, shape index: {}]   ;;  %s453_s5 = inlined_call_operand.vmem [shape: f32[8,128], index: 5, kind: output, shape index: {}]  }
   0x1   :  { %294 = vmatprep.subr.bf16.mxu0 %v356_v0  ;;  %v336_v1 = vld [vmem:[%s448_s1] sm:$0xff]   ;;  %310 = vmatprep.mubr.msk.bf16.mxu0 %vm357_vm0, %v356_v0  ;;  %v337_v2 = vld [vmem:[%s448_s1 + $0x8] sm:$0xff]   ;;  %v338_v3 = vld [vmem:[%s448_s1 + $0x10] sm:$0xff]  }
   0x2   :  { %314 = vmatprep.subr.bf16.mxu1 %v356_v0  ;;  %330 = vmatprep.mubr.msk.bf16.mxu1 %vm357_vm0, %v356_v0  ;;  %v344_v4 = vld [vmem:[%s449_s3] sm:$0xff]   ;;  %v339_v5 = vld [vmem:[%s448_s1 + $0x18] sm:$0xff]   ;;  %v345_v6 = vld [vmem:[%s449_s3 + $0x8] sm:$0xff]  }
   0x3   :  { %295 = vmatpush3.bf16.msra.mxu0 %v336_v1  ;;  %315 = vmatpush3.bf16.msra.mxu1 %v344_v4  ;;  %v340_v7 = vld [vmem:[%s448_s1 + $0x20] sm:$0xff]   ;;  %v346_v8 = vld [vmem:[%s449_s3 + $0x10] sm:$0xff]   ;;  %v341_v9 = vld [vmem:[%s448_s1 + $0x28] sm:$0xff]  }
   0x4   :  { %296 = vmatprep.subr.bf16.mxu0 %v356_v0  ;;  %316 = vmatprep.subr.bf16.mxu1 %v356_v0  ;;  %v347_v10 = vld [vmem:[%s449_s3 + $0x18] sm:$0xff]   ;;  %v342_v11 = vld [vmem:[%s448_s1 + $0x30] sm:$0xff]   ;;  %v348_v12 = vld [vmem:[%s449_s3 + $0x20] sm:$0xff]  }
   0x5   :  { %v343_v13 = vld [vmem:[%s448_s1 + $0x38] sm:$0xff]   ;;  %v349_v14 = vld [vmem:[%s449_s3 + $0x28] sm:$0xff]   ;;  %v21_v15 = vld [vmem:[%s450_s0] sm:$0xf] }
   0x6   :  { %v350_v16 = vld [vmem:[%s449_s3 + $0x30] sm:$0xff]   ;;  %v351_v17 = vld [vmem:[%s449_s3 + $0x38] sm:$0xff]   ;;  %v257_v18 = vld [vmem:[%s451_s2] ss:$0 sm:$0xff] }
   0x7   :  { %297 = vmatpush3.bf16.msra.mxu0 %v337_v2  ;;  %317 = vmatpush3.bf16.msra.mxu1 %v345_v6  ;;  %v266_v26 = vld [vmem:[%s452_s4] ss:$0 sm:$0xff] }
   0x8   :  { %298 = vmatprep.subr.bf16.mxu0 %v356_v0  ;;  %318 = vmatprep.subr.bf16.mxu1 %v356_v0 }
   0xb   :  { %299 = vmatpush3.bf16.msra.mxu0 %v338_v3  ;;  %319 = vmatpush3.bf16.msra.mxu1 %v346_v8 }
   0xc   :  { %300 = vmatprep.subr.bf16.mxu0 %v356_v0  ;;  %320 = vmatprep.subr.bf16.mxu1 %v356_v0 }
   0xf   :  { %301 = vmatpush3.bf16.msra.mxu0 %v339_v5  ;;  %321 = vmatpush3.bf16.msra.mxu1 %v347_v10 }
  0x10   :  { %302 = vmatprep.subr.bf16.mxu0 %v356_v0  ;;  %322 = vmatprep.subr.bf16.mxu1 %v356_v0 }
  0x13   :  { %303 = vmatpush3.bf16.msra.mxu0 %v340_v7  ;;  %323 = vmatpush3.bf16.msra.mxu1 %v348_v12 }
  0x14   :  { %304 = vmatprep.subr.bf16.mxu0 %v356_v0  ;;  %324 = vmatprep.subr.bf16.mxu1 %v356_v0 }
  0x17   :  { %305 = vmatpush3.bf16.msra.mxu0 %v341_v9  ;;  %325 = vmatpush3.bf16.msra.mxu1 %v349_v14 }
  0x18   :  { %306 = vmatprep.subr.bf16.mxu0 %v356_v0  ;;  %326 = vmatprep.subr.bf16.mxu1 %v356_v0 }
  0x1b   :  { %307 = vmatpush3.bf16.msra.mxu0 %v342_v11  ;;  %327 = vmatpush3.bf16.msra.mxu1 %v350_v16 }
  0x1c   :  { %308 = vmatprep.subr.bf16.mxu0 %v356_v0  ;;  %328 = vmatprep.subr.bf16.mxu1 %v356_v0 }
  0x1f   :  { %309 = vmatpush3.bf16.msra.mxu0 %v343_v13  ;;  %329 = vmatpush3.bf16.msra.mxu1 %v351_v17 }
  0x22   :  { %311 = vmatmul.mubr.bf16.vlgmr.msra.gmra.mrb[0].mxu0 %v21_v15 }
  0xf5   :  { %v127_v19 = vpop.f32.mrb[0].mxu0 }
  0xf6   :  { %v128_v20 = vadd.f32 %v257_v18, %v127_v19  ;;  %v312_v21 = vpop.f32.mrb[1].mxu0 }
  0xf7   :  { %v130_v22 = vpop.f32.mrb[2].mxu0 }
  0xf8   :  { %v133_v23 = vmax.f32 %v128_v20, 0.0  ;;  %v313_v24 = vpop.f32.mrb[3].mxu0 }
  0xfa   :  { %v134_v25 = vpack.c.bf16 %v133_v23, %v133_v23 }
  0xfc   :  { %331 = vmatmul.mubr.bf16.vlgmr.msra.gmra.mrb[0].mxu1 %v134_v25 }
 0x1cf   :  { %v240_v27 = vpop.f32.mrb[0].mxu1 }
 0x1d0   :  { %v241_v28 = vadd.f32 %v266_v26, %v240_v27  ;;  %v332_v29 = vpop.f32.mrb[1].mxu1 }
 0x1d1   :  { %v243_v30 = vpop.f32.mrb[2].mxu1 }
 0x1d2   :  { %v275_v31 = vmul.f32 -1.442695, %v241_v28  ;;  %v333_v32 = vpop.f32.mrb[3].mxu1 }
 0x1d4   :  { %352 = vpow2.f32 %v275_v31 }
 0x1de   :  { %v353_v33 = vpop.eup %352 }
 0x1df   :  { %v249_v34 = vadd.f32 1.0, %v353_v33 }
 0x1e1   :  { %354 = vrcp.f32 %v249_v34 }
 0x1eb   :  { %v355_v35 = vpop.eup %354 }
 0x1ec   :  { %252 = vst [vmem:[%s453_s5] sm:$0xff] %v355_v35 }

</bundles_post_ra>
